<compile_context>
chip_gen: v7x
topology: tpu7x:2x2x1
jax: 0.10.0
libtpu: 0.0.40
codegen_flags: <defaults>
</compile_context>

<pallas_src>
import functools

import jax
import jax.numpy as jnp
from jax.experimental import pallas as pl
from jax.experimental.pallas import tpu as pltpu

FORCE = True
FEAT_AUG = "dist"
NUM_PARTICLES = 22
INPUT_DIM = NUM_PARTICLES * (3 + 1)     # 88
POS_DIM = NUM_PARTICLES * 3             # 66
OUTPUT_DIM = NUM_PARTICLES * 3          # 66
OUTPUT_DIM_PAD = 128                    # lane-dense padded output width
HIDDEN = (128, 256, 256, 256, 128)


def _round_up(x, m):
    return (x + m - 1) // m * m


# ----------------------------- Pallas kernel ------------------------------ #
def _mlp_kernel(pos_ref, tgt_ref, sel_ref,
                w1p, w1d, b1, w2, b2, w3, b3, w4, b4, w5, b5, w6,
                o_ref):
    """Fused feat-aug + 6-layer MLP for one batch tile; all operands in VMEM."""
    pos = pos_ref[...]                                    # (tb, 66) f32
    diff = pos - tgt_ref[...]
    # per-particle squared distance via a (66, 22) 0/1 selection matmul (MXU,
    # f32 to keep the sqrt accurate); result (tb, 22)
    d2 = jnp.dot(diff * diff, sel_ref[...], preferred_element_type=jnp.float32)
    dist = jnp.sqrt(d2)

    # layer 1: x @ W1 == pos @ W1_pos + dist @ W1_dist   (W1 pre-split, bf16)
    h = (jnp.dot(pos.astype(jnp.bfloat16), w1p[...],
                 preferred_element_type=jnp.float32)
         + jnp.dot(dist.astype(jnp.bfloat16), w1d[...],
                   preferred_element_type=jnp.float32)
         + b1[...])
    h = jnp.maximum(h, 0.0)

    def dense_relu(h, w_ref, b_ref):
        y = jnp.dot(h.astype(jnp.bfloat16), w_ref[...],
                    preferred_element_type=jnp.float32)
        return jnp.maximum(y + b_ref[...], 0.0)

    h = dense_relu(h, w2, b2)
    h = dense_relu(h, w3, b3)
    h = dense_relu(h, w4, b4)
    h = dense_relu(h, w5, b5)
    # final layer: Linear(128, 66, bias=False); columns zero-padded to 128 lanes
    o_ref[...] = jnp.dot(h.astype(jnp.bfloat16), w6[...],
                         preferred_element_type=jnp.float32)


def mlp_pallas(pos_flat, tgt_flat, sel, kparams, *, tile_b=256):
    """pos_flat, tgt_flat: (B, 66) -> (B, OUTPUT_DIM_PAD) via one pallas_call."""
    B, F = pos_flat.shape

    # Cap the tile at ceil(B/2) (>= 2 grid steps whenever B > 8, so the
    # "parallel" axis can shard across v7x's two TensorCores); keep it a
    # multiple of 8 sublanes; pad the batch up to a tile multiple.
    half = max(8, _round_up((B + 1) // 2, 8))
    tile_b = max(8, min(_round_up(tile_b, 8), half))
    Bp = _round_up(B, tile_b)
    if Bp != B:
        pad = Bp - B
        pos_flat = jnp.pad(pos_flat, ((0, pad), (0, 0)))
        tgt_flat = jnp.pad(tgt_flat, ((0, pad), (0, 0)))

    x_spec = pl.BlockSpec((tile_b, F), lambda i: (i, 0))
    const2d = lambda i: (0, 0)     # weights/biases/sel: whole array, stays resident
    in_specs = [x_spec, x_spec, pl.BlockSpec(sel.shape, const2d)]
    in_specs += [pl.BlockSpec(p.shape, const2d) for p in kparams]

    out = pl.pallas_call(
        _mlp_kernel,
        out_shape=jax.ShapeDtypeStruct((Bp, OUTPUT_DIM_PAD), jnp.float32),
        grid_spec=pltpu.PrefetchScalarGridSpec(
            num_scalar_prefetch=0,
            grid=(Bp // tile_b,),
            in_specs=in_specs,
            out_specs=pl.BlockSpec((tile_b, OUTPUT_DIM_PAD), lambda i: (i, 0)),
        ),
        compiler_params=pltpu.CompilerParams(
            dimension_semantics=("parallel",),
            # At tile_b=256, VMEM use is ~1 MB (weights + double-buffered I/O),
            # far below the default scoped limit on v5e/v6e/v7x.
        ),
    )(pos_flat, tgt_flat, sel, *kparams)
    return out[:B]


# ------------------------------ module glue ------------------------------- #
def init_params(key):
    """Deterministic init matching the nn.Sequential layer shapes (f32, (in,out))."""
    dims = (INPUT_DIM,) + HIDDEN + (OUTPUT_DIM,)
    params = []
    for li in range(len(dims) - 1):
        fan_in, fan_out = dims[li], dims[li + 1]
        key, wk, bk = jax.random.split(key, 3)
        bound = 1.0 / jnp.sqrt(fan_in)
        w = jax.random.uniform(wk, (fan_in, fan_out), jnp.float32, -bound, bound)
        if li < len(dims) - 2:  # last Linear has bias=False
            b = jax.random.uniform(bk, (1, fan_out), jnp.float32, -bound, bound)
        else:
            b = None
        params.append((w, b))
    log_z = jnp.float32(0.0)  # nn.Parameter(torch.tensor(0.0)); unused in forward
    return params, log_z


def prepare_kernel_params(params):
    """One-time transform: split W1 into pos/dist rows, bf16 weights, pad W6."""
    (w1, b1), (w2, b2), (w3, b3), (w4, b4), (w5, b5), (w6, _) = params
    # input layout is [p0x,p0y,p0z,d0, p1x,...] -> split rows per particle
    w1r = w1.reshape(NUM_PARTICLES, 4, HIDDEN[0])
    w1p = w1r[:, :3, :].reshape(POS_DIM, HIDDEN[0])       # (66, 128)
    w1d = w1r[:, 3, :]                                    # (22, 128)
    w6p = jnp.zeros((HIDDEN[-1], OUTPUT_DIM_PAD), jnp.float32)
    w6p = w6p.at[:, :OUTPUT_DIM].set(w6)                  # (128, 128) zero-padded
    bf = lambda a: a.astype(jnp.bfloat16)
    return (bf(w1p), bf(w1d), b1, bf(w2), b2, bf(w3), b3,
            bf(w4), b4, bf(w5), b5, bf(w6p))


def _dist_selector():
    """(66, 22) 0/1 matrix: column i sums the 3 squared coords of particle i."""
    r = jnp.arange(POS_DIM) // 3
    c = jnp.arange(NUM_PARTICLES)
    return (r[:, None] == c[None, :]).astype(jnp.float32)


@functools.partial(jax.jit, static_argnames=("tile_b",))
def alanine_forward(pos, target, kparams, *, tile_b=256):
    """pos, target: (B, N, 3) float32 -> force: (B, N, 3) float32."""
    B = pos.shape[0]
    pos_flat = pos.reshape(B, POS_DIM)
    tgt_flat = target.reshape(B, POS_DIM)
    sel = _dist_selector()
    out = mlp_pallas(pos_flat, tgt_flat, sel, kparams, tile_b=tile_b)
    out = out[:, :OUTPUT_DIM]
    if FORCE:
        return out.reshape(pos.shape)
    # TODO(synk): force=False path needs -grad(out.sum(), pos); would require a
    # hand-written backward kernel (or jax.grad around the whole pallas_call).
    raise NotImplementedError


def alanine_reference(pos, target, params, *, emulate_bf16=False):
    """Pure-JAX reference. emulate_bf16=True mirrors the kernel's bf16 matmuls."""
    dist = jnp.sqrt(jnp.sum((pos - target) ** 2, axis=-1, keepdims=True))
    x = jnp.concatenate([pos, dist], axis=-1).reshape(-1, INPUT_DIM)
    cast = (lambda a: a.astype(jnp.bfloat16)) if emulate_bf16 else (lambda a: a)
    h = x
    for w, b in params[:-1]:
        y = jnp.dot(cast(h), cast(w), preferred_element_type=jnp.float32)
        h = jnp.maximum(y + b, 0.0)
    w6, _ = params[-1]
    out = jnp.dot(cast(h), cast(w6), preferred_element_type=jnp.float32)
    return out.reshape(pos.shape)


# --------------------------------- main ------------------------------------ #
if __name__ == "__main__":
    key = jax.random.PRNGKey(0)
    pkey, xkey, tkey = jax.random.split(key, 3)

    params, _log_z = init_params(pkey)
    kparams = prepare_kernel_params(params)

    B = 20  # deliberately not a tile multiple: exercises padding + 2-step grid
    pos = jax.random.normal(xkey, (B, NUM_PARTICLES, 3), jnp.float32)
    target = jax.random.normal(tkey, (B, NUM_PARTICLES, 3), jnp.float32)

    force = alanine_forward(pos, target, kparams)
    force = jax.block_until_ready(force)

    assert force.shape == pos.shape and force.dtype == jnp.float32

    # tight check vs a reference that mirrors the kernel's bf16/f32-acc numerics
    ref_bf16 = alanine_reference(pos, target, params, emulate_bf16=True)
    assert jnp.allclose(force, ref_bf16, atol=5e-3, rtol=3e-2), (
        "mismatch vs bf16 ref, max abs diff "
        f"{float(jnp.max(jnp.abs(force - ref_bf16)))}")

    # loose semantic check vs the full-f32 torch-equivalent math
    ref_f32 = alanine_reference(pos, target, params, emulate_bf16=False)
    assert jnp.allclose(force, ref_f32, atol=1.5e-1, rtol=1.5e-1), (
        "mismatch vs f32 ref, max abs diff "
        f"{float(jnp.max(jnp.abs(force - ref_f32)))}")

    print("KERNEL_OK")
</pallas_src>

<mosaic_0001>
module attributes {stable_mosaic.version = 11 : i64} {
  func.func @_mlp_kernel(%arg0: i32, %arg1: memref<16x66xf32, #tpu.memory_space<vmem>>, %arg2: memref<16x66xf32, #tpu.memory_space<vmem>>, %arg3: memref<66x22xf32, #tpu.memory_space<vmem>>, %arg4: memref<66x128xbf16, #tpu.memory_space<vmem>>, %arg5: memref<22x128xbf16, #tpu.memory_space<vmem>>, %arg6: memref<1x128xf32, #tpu.memory_space<vmem>>, %arg7: memref<128x256xbf16, #tpu.memory_space<vmem>>, %arg8: memref<1x256xf32, #tpu.memory_space<vmem>>, %arg9: memref<256x256xbf16, #tpu.memory_space<vmem>>, %arg10: memref<1x256xf32, #tpu.memory_space<vmem>>, %arg11: memref<256x256xbf16, #tpu.memory_space<vmem>>, %arg12: memref<1x256xf32, #tpu.memory_space<vmem>>, %arg13: memref<256x128xbf16, #tpu.memory_space<vmem>>, %arg14: memref<1x128xf32, #tpu.memory_space<vmem>>, %arg15: memref<128x128xbf16, #tpu.memory_space<vmem>>, %arg16: memref<16x128xf32, #tpu.memory_space<vmem>>) attributes {dimension_semantics = [#tpu.dimension_semantics<parallel>], iteration_bounds = array<i64: 2>, scalar_prefetch = 0 : i64, scratch_operands = 0 : i64, tpu.core_type = #tpu.core_type<tc>, window_params = [{transform_indices = @transform_0, window_bounds = array<i64: 16, 66>}, {transform_indices = @transform_1, window_bounds = array<i64: 16, 66>}, {pipeline_mode = #tpu.pipeline_mode<synchronous>, transform_indices = @transform_2, window_bounds = array<i64: 66, 22>}, {pipeline_mode = #tpu.pipeline_mode<synchronous>, transform_indices = @transform_3, window_bounds = array<i64: 66, 128>}, {pipeline_mode = #tpu.pipeline_mode<synchronous>, transform_indices = @transform_4, window_bounds = array<i64: 22, 128>}, {pipeline_mode = #tpu.pipeline_mode<synchronous>, transform_indices = @transform_5, window_bounds = array<i64: 1, 128>}, {pipeline_mode = #tpu.pipeline_mode<synchronous>, transform_indices = @transform_6, window_bounds = array<i64: 128, 256>}, {pipeline_mode = #tpu.pipeline_mode<synchronous>, transform_indices = @transform_7, window_bounds = array<i64: 1, 256>}, {pipeline_mode = #tpu.pipeline_mode<synchronous>, transform_indices = @transform_8, window_bounds = array<i64: 256, 256>}, {pipeline_mode = #tpu.pipeline_mode<synchronous>, transform_indices = @transform_9, window_bounds = array<i64: 1, 256>}, {pipeline_mode = #tpu.pipeline_mode<synchronous>, transform_indices = @transform_10, window_bounds = array<i64: 256, 256>}, {pipeline_mode = #tpu.pipeline_mode<synchronous>, transform_indices = @transform_11, window_bounds = array<i64: 1, 256>}, {pipeline_mode = #tpu.pipeline_mode<synchronous>, transform_indices = @transform_12, window_bounds = array<i64: 256, 128>}, {pipeline_mode = #tpu.pipeline_mode<synchronous>, transform_indices = @transform_13, window_bounds = array<i64: 1, 128>}, {pipeline_mode = #tpu.pipeline_mode<synchronous>, transform_indices = @transform_14, window_bounds = array<i64: 128, 128>}, {transform_indices = @transform_15, window_bounds = array<i64: 16, 128>}]} {
    %c0 = arith.constant 0 : index
    %c0_0 = arith.constant 0 : index
    %0 = vector.load %arg1[%c0, %c0_0] : memref<16x66xf32, #tpu.memory_space<vmem>>, vector<16x66xf32>
    %c0_1 = arith.constant 0 : index
    %c0_2 = arith.constant 0 : index
    %1 = vector.load %arg2[%c0_1, %c0_2] : memref<16x66xf32, #tpu.memory_space<vmem>>, vector<16x66xf32>
    %2 = arith.subf %0, %1 : vector<16x66xf32>
    %3 = arith.mulf %2, %2 : vector<16x66xf32>
    %c0_3 = arith.constant 0 : index
    %c0_4 = arith.constant 0 : index
    %4 = vector.load %arg3[%c0_3, %c0_4] : memref<66x22xf32, #tpu.memory_space<vmem>>, vector<66x22xf32>
    %cst = arith.constant dense<0.000000e+00> : vector<16x22xf32>
    %5 = tpu.matmul %3, %4, %cst {dimension_numbers = #tpu.dot_dimension_numbers<[1], [0], [0], [1], [0, 0, 1, 1], [], []>} : vector<16x66xf32>, vector<66x22xf32>, vector<16x22xf32> -> vector<16x22xf32>
    %6 = math.sqrt %5 : vector<16x22xf32>
    %7 = arith.truncf %0 : vector<16x66xf32> to vector<16x66xbf16>
    %c0_5 = arith.constant 0 : index
    %c0_6 = arith.constant 0 : index
    %8 = vector.load %arg4[%c0_5, %c0_6] : memref<66x128xbf16, #tpu.memory_space<vmem>>, vector<66x128xbf16>
    %cst_7 = arith.constant dense<0.000000e+00> : vector<16x128xf32>
    %9 = tpu.matmul %7, %8, %cst_7 {dimension_numbers = #tpu.dot_dimension_numbers<[1], [0], [0], [1], [0, 0, 1, 1], [], []>} : vector<16x66xbf16>, vector<66x128xbf16>, vector<16x128xf32> -> vector<16x128xf32>
    %10 = arith.truncf %6 : vector<16x22xf32> to vector<16x22xbf16>
    %c0_8 = arith.constant 0 : index
    %c0_9 = arith.constant 0 : index
    %11 = vector.load %arg5[%c0_8, %c0_9] : memref<22x128xbf16, #tpu.memory_space<vmem>>, vector<22x128xbf16>
    %cst_10 = arith.constant dense<0.000000e+00> : vector<16x128xf32>
    %12 = tpu.matmul %10, %11, %cst_10 {dimension_numbers = #tpu.dot_dimension_numbers<[1], [0], [0], [1], [0, 0, 1, 1], [], []>} : vector<16x22xbf16>, vector<22x128xbf16>, vector<16x128xf32> -> vector<16x128xf32>
    %13 = arith.addf %9, %12 : vector<16x128xf32>
    %c0_11 = arith.constant 0 : index
    %c0_12 = arith.constant 0 : index
    %14 = vector.load %arg6[%c0_11, %c0_12] : memref<1x128xf32, #tpu.memory_space<vmem>>, vector<1x128xf32>
    %15 = vector.broadcast %14 : vector<1x128xf32> to vector<16x128xf32>
    %16 = arith.addf %13, %15 : vector<16x128xf32>
    %cst_13 = arith.constant 0.000000e+00 : f32
    %17 = vector.broadcast %cst_13 : f32 to vector<16x128xf32>
    %18 = arith.maximumf %16, %17 : vector<16x128xf32>
    %19 = arith.truncf %18 : vector<16x128xf32> to vector<16x128xbf16>
    %c0_14 = arith.constant 0 : index
    %c0_15 = arith.constant 0 : index
    %20 = vector.load %arg7[%c0_14, %c0_15] : memref<128x256xbf16, #tpu.memory_space<vmem>>, vector<128x256xbf16>
    %cst_16 = arith.constant dense<0.000000e+00> : vector<16x256xf32>
    %21 = tpu.matmul %19, %20, %cst_16 {dimension_numbers = #tpu.dot_dimension_numbers<[1], [0], [0], [1], [0, 0, 1, 1], [], []>} : vector<16x128xbf16>, vector<128x256xbf16>, vector<16x256xf32> -> vector<16x256xf32>
    %c0_17 = arith.constant 0 : index
    %c0_18 = arith.constant 0 : index
    %22 = vector.load %arg8[%c0_17, %c0_18] : memref<1x256xf32, #tpu.memory_space<vmem>>, vector<1x256xf32>
    %23 = vector.broadcast %22 : vector<1x256xf32> to vector<16x256xf32>
    %24 = arith.addf %21, %23 : vector<16x256xf32>
    %cst_19 = arith.constant 0.000000e+00 : f32
    %25 = vector.broadcast %cst_19 : f32 to vector<16x256xf32>
    %26 = arith.maximumf %24, %25 : vector<16x256xf32>
    %27 = arith.truncf %26 : vector<16x256xf32> to vector<16x256xbf16>
    %c0_20 = arith.constant 0 : index
    %c0_21 = arith.constant 0 : index
    %28 = vector.load %arg9[%c0_20, %c0_21] : memref<256x256xbf16, #tpu.memory_space<vmem>>, vector<256x256xbf16>
    %cst_22 = arith.constant dense<0.000000e+00> : vector<16x256xf32>
    %29 = tpu.matmul %27, %28, %cst_22 {dimension_numbers = #tpu.dot_dimension_numbers<[1], [0], [0], [1], [0, 0, 1, 1], [], []>} : vector<16x256xbf16>, vector<256x256xbf16>, vector<16x256xf32> -> vector<16x256xf32>
    %c0_23 = arith.constant 0 : index
    %c0_24 = arith.constant 0 : index
    %30 = vector.load %arg10[%c0_23, %c0_24] : memref<1x256xf32, #tpu.memory_space<vmem>>, vector<1x256xf32>
    %31 = vector.broadcast %30 : vector<1x256xf32> to vector<16x256xf32>
    %32 = arith.addf %29, %31 : vector<16x256xf32>
    %cst_25 = arith.constant 0.000000e+00 : f32
    %33 = vector.broadcast %cst_25 : f32 to vector<16x256xf32>
    %34 = arith.maximumf %32, %33 : vector<16x256xf32>
    %35 = arith.truncf %34 : vector<16x256xf32> to vector<16x256xbf16>
    %c0_26 = arith.constant 0 : index
    %c0_27 = arith.constant 0 : index
    %36 = vector.load %arg11[%c0_26, %c0_27] : memref<256x256xbf16, #tpu.memory_space<vmem>>, vector<256x256xbf16>
    %cst_28 = arith.constant dense<0.000000e+00> : vector<16x256xf32>
    %37 = tpu.matmul %35, %36, %cst_28 {dimension_numbers = #tpu.dot_dimension_numbers<[1], [0], [0], [1], [0, 0, 1, 1], [], []>} : vector<16x256xbf16>, vector<256x256xbf16>, vector<16x256xf32> -> vector<16x256xf32>
    %c0_29 = arith.constant 0 : index
    %c0_30 = arith.constant 0 : index
    %38 = vector.load %arg12[%c0_29, %c0_30] : memref<1x256xf32, #tpu.memory_space<vmem>>, vector<1x256xf32>
    %39 = vector.broadcast %38 : vector<1x256xf32> to vector<16x256xf32>
    %40 = arith.addf %37, %39 : vector<16x256xf32>
    %cst_31 = arith.constant 0.000000e+00 : f32
    %41 = vector.broadcast %cst_31 : f32 to vector<16x256xf32>
    %42 = arith.maximumf %40, %41 : vector<16x256xf32>
    %43 = arith.truncf %42 : vector<16x256xf32> to vector<16x256xbf16>
    %c0_32 = arith.constant 0 : index
    %c0_33 = arith.constant 0 : index
    %44 = vector.load %arg13[%c0_32, %c0_33] : memref<256x128xbf16, #tpu.memory_space<vmem>>, vector<256x128xbf16>
    %cst_34 = arith.constant dense<0.000000e+00> : vector<16x128xf32>
    %45 = tpu.matmul %43, %44, %cst_34 {dimension_numbers = #tpu.dot_dimension_numbers<[1], [0], [0], [1], [0, 0, 1, 1], [], []>} : vector<16x256xbf16>, vector<256x128xbf16>, vector<16x128xf32> -> vector<16x128xf32>
    %c0_35 = arith.constant 0 : index
    %c0_36 = arith.constant 0 : index
    %46 = vector.load %arg14[%c0_35, %c0_36] : memref<1x128xf32, #tpu.memory_space<vmem>>, vector<1x128xf32>
    %47 = vector.broadcast %46 : vector<1x128xf32> to vector<16x128xf32>
    %48 = arith.addf %45, %47 : vector<16x128xf32>
    %cst_37 = arith.constant 0.000000e+00 : f32
    %49 = vector.broadcast %cst_37 : f32 to vector<16x128xf32>
    %50 = arith.maximumf %48, %49 : vector<16x128xf32>
    %51 = arith.truncf %50 : vector<16x128xf32> to vector<16x128xbf16>
    %c0_38 = arith.constant 0 : index
    %c0_39 = arith.constant 0 : index
    %52 = vector.load %arg15[%c0_38, %c0_39] : memref<128x128xbf16, #tpu.memory_space<vmem>>, vector<128x128xbf16>
    %cst_40 = arith.constant dense<0.000000e+00> : vector<16x128xf32>
    %53 = tpu.matmul %51, %52, %cst_40 {dimension_numbers = #tpu.dot_dimension_numbers<[1], [0], [0], [1], [0, 0, 1, 1], [], []>} : vector<16x128xbf16>, vector<128x128xbf16>, vector<16x128xf32> -> vector<16x128xf32>
    %c0_41 = arith.constant 0 : index
    %c0_42 = arith.constant 0 : index
    %54 = vector.load %arg16[%c0_41, %c0_42] : memref<16x128xf32, #tpu.memory_space<vmem>>, vector<16x128xf32>
    tpu.vector_store %arg16[%c0_41, %c0_42], %53 {strides = array<i32>} : memref<16x128xf32, #tpu.memory_space<vmem>>, vector<16x128xf32>,
    return
  }
  func.func @transform_0(%arg0: i32) -> (i32, i32) {
    %c0_i32 = arith.constant 0 : i32
    %c0_i32_0 = arith.constant 0 : i32
    return %arg0, %c0_i32 : i32, i32
  }
  func.func @transform_1(%arg0: i32) -> (i32, i32) {
    %c0_i32 = arith.constant 0 : i32
    %c0_i32_0 = arith.constant 0 : i32
    return %arg0, %c0_i32 : i32, i32
  }
  func.func @transform_2(%arg0: i32) -> (i32, i32) {
    %c0_i32 = arith.constant 0 : i32
    %c0_i32_0 = arith.constant 0 : i32
    %c0_i32_1 = arith.constant 0 : i32
    return %c0_i32, %c0_i32_0 : i32, i32
  }
  func.func @transform_3(%arg0: i32) -> (i32, i32) {
    %c0_i32 = arith.constant 0 : i32
    %c0_i32_0 = arith.constant 0 : i32
    %c0_i32_1 = arith.constant 0 : i32
    return %c0_i32, %c0_i32_0 : i32, i32
  }
  func.func @transform_4(%arg0: i32) -> (i32, i32) {
    %c0_i32 = arith.constant 0 : i32
    %c0_i32_0 = arith.constant 0 : i32
    %c0_i32_1 = arith.constant 0 : i32
    return %c0_i32, %c0_i32_0 : i32, i32
  }
  func.func @transform_5(%arg0: i32) -> (i32, i32) {
    %c0_i32 = arith.constant 0 : i32
    %c0_i32_0 = arith.constant 0 : i32
    %c0_i32_1 = arith.constant 0 : i32
    return %c0_i32, %c0_i32_0 : i32, i32
  }
  func.func @transform_6(%arg0: i32) -> (i32, i32) {
    %c0_i32 = arith.constant 0 : i32
    %c0_i32_0 = arith.constant 0 : i32
    %c0_i32_1 = arith.constant 0 : i32
    return %c0_i32, %c0_i32_0 : i32, i32
  }
  func.func @transform_7(%arg0: i32) -> (i32, i32) {
    %c0_i32 = arith.constant 0 : i32
    %c0_i32_0 = arith.constant 0 : i32
    %c0_i32_1 = arith.constant 0 : i32
    return %c0_i32, %c0_i32_0 : i32, i32
  }
  func.func @transform_8(%arg0: i32) -> (i32, i32) {
    %c0_i32 = arith.constant 0 : i32
    %c0_i32_0 = arith.constant 0 : i32
    %c0_i32_1 = arith.constant 0 : i32
    return %c0_i32, %c0_i32_0 : i32, i32
  }
  func.func @transform_9(%arg0: i32) -> (i32, i32) {
    %c0_i32 = arith.constant 0 : i32
    %c0_i32_0 = arith.constant 0 : i32
    %c0_i32_1 = arith.constant 0 : i32
    return %c0_i32, %c0_i32_0 : i32, i32
  }
  func.func @transform_10(%arg0: i32) -> (i32, i32) {
    %c0_i32 = arith.constant 0 : i32
    %c0_i32_0 = arith.constant 0 : i32
    %c0_i32_1 = arith.constant 0 : i32
    return %c0_i32, %c0_i32_0 : i32, i32
  }
  func.func @transform_11(%arg0: i32) -> (i32, i32) {
    %c0_i32 = arith.constant 0 : i32
    %c0_i32_0 = arith.constant 0 : i32
    %c0_i32_1 = arith.constant 0 : i32
    return %c0_i32, %c0_i32_0 : i32, i32
  }
  func.func @transform_12(%arg0: i32) -> (i32, i32) {
    %c0_i32 = arith.constant 0 : i32
    %c0_i32_0 = arith.constant 0 : i32
    %c0_i32_1 = arith.constant 0 : i32
    return %c0_i32, %c0_i32_0 : i32, i32
  }
  func.func @transform_13(%arg0: i32) -> (i32, i32) {
    %c0_i32 = arith.constant 0 : i32
    %c0_i32_0 = arith.constant 0 : i32
    %c0_i32_1 = arith.constant 0 : i32
    return %c0_i32, %c0_i32_0 : i32, i32
  }
  func.func @transform_14(%arg0: i32) -> (i32, i32) {
    %c0_i32 = arith.constant 0 : i32
    %c0_i32_0 = arith.constant 0 : i32
    %c0_i32_1 = arith.constant 0 : i32
    return %c0_i32, %c0_i32_0 : i32, i32
  }
  func.func @transform_15(%arg0: i32) -> (i32, i32) {
    %c0_i32 = arith.constant 0 : i32
    %c0_i32_0 = arith.constant 0 : i32
    return %arg0, %c0_i32 : i32, i32
  }
}

</mosaic_0001>

<bundles_post_ra>
// kernel: alanine_forward.1
= control target key start
LH: loop header
LB: loop body
LE: loop exit
PB: predicated region body
PF: predicated region fallthrough
CT: control target
= control target key end

     0   :  { %s2332_s18 = smov 0   ;;  %s2772_s0 = inlined_call_operand.vmem [shape: f32[32,66], index: 0, kind: input, shape index: {}]   ;;  %s2773_s1 = inlined_call_operand.vmem [shape: f32[32,66], index: 1, kind: input, shape index: {}]   ;;  %s2774_s2 = inlined_call_operand.vmem [shape: f32[66,22], index: 2, kind: input, shape index: {}]   ;;  %s2775_s3 = inlined_call_operand.vmem [shape: bf16[66,128], index: 3, kind: input, shape index: {}]   ;;  %s2776_s4 = inlined_call_operand.vmem [shape: bf16[22,128], index: 4, kind: input, shape index: {}]   ;;  %s2777_s5 = inlined_call_operand.vmem [shape: f32[1,128], index: 5, kind: input, shape index: {}]   ;;  %s2778_s6 = inlined_call_operand.vmem [shape: bf16[128,256], index: 6, kind: input, shape index: {}]   ;;  %s2779_s7 = inlined_call_operand.vmem [shape: f32[1,256], index: 7, kind: input, shape index: {}]   ;;  %s2780_s8 = inlined_call_operand.vmem [shape: bf16[256,256], index: 8, kind: input, shape index: {}]   ;;  %s2781_s9 = inlined_call_operand.vmem [shape: f32[1,256], index: 9, kind: input, shape index: {}]   ;;  %s2782_s10 = inlined_call_operand.vmem [shape: bf16[256,256], index: 10, kind: input, shape index: {}]   ;;  %s2783_s11 = inlined_call_operand.vmem [shape: f32[1,256], index: 11, kind: input, shape index: {}]   ;;  %s2784_s12 = inlined_call_operand.vmem [shape: bf16[256,128], index: 12, kind: input, shape index: {}]   ;;  %s2785_s13 = inlined_call_operand.vmem [shape: f32[1,128], index: 13, kind: input, shape index: {}]   ;;  %s2786_s14 = inlined_call_operand.vmem [shape: bf16[128,128], index: 14, kind: input, shape index: {}]   ;;  %s2787_s15 = inlined_call_operand.vmem [shape: f32[32,128], index: 15, kind: output, shape index: {}]  }
   0x1 LB: > { %s1814_s19 = sadd.s32 4294967295, %s2247_s18   ;;  %p1818_p0 = scmp.ge.s32.totalorder %s2247_s18, 1  ;;  %s2247_s18 = sphi %s2332_s18, %s25_s18  }
   0x2   : > { %p449_p1 = scmp.lt.s32.totalorder %s2247_s18, 3 }
   0x4   : > { %p450_p2 = pnand %p1818_p0, %p449_p1 }
   0x5   : > { %v529_v0 = vld [vmem:[%s2774_s2] sm:$0xff] (!%p450_p2)  ;;  %v530_v1 = vld [vmem:[%s2774_s2 + $0x8] sm:$0xff] (!%p450_p2)  ;;  %v531_v2 = vld [vmem:[%s2774_s2 + $0x10] sm:$0xff] (!%p450_p2)  ;;  %s1819_s26 = sshll.u32 (!%p450_p2), %s1814_s19, 1  ;;  %v2249_v8 = vmov (!%p450_p2), 0.0   ;;  %vm538_vm0 = vcmask (!%p450_p2), 539648  }
   0x6   : > { %453 = sbr.rel (%p450_p2) target bundleno = 1582 (0x62e), region = 80  ;;  %v2059_v3 = vpack.c.bf16 (!%p450_p2), %v530_v1, %v529_v0  ;;  %v532_v4 = vld [vmem:[%s2774_s2 + $0x18] sm:$0xff] (!%p450_p2)  ;;  %p503_p3 = scmp.lt.s32.totalorder (!%p450_p2), %s1819_s26, 3  ;;  %v533_v6 = vld [vmem:[%s2774_s2 + $0x20] sm:$0xff] (!%p450_p2)  ;;  %v534_v7 = vld [vmem:[%s2774_s2 + $0x28] sm:$0xff] (!%p450_p2)  ;;  %2017 = vmatprep.subr.bf16.mxu0 (!%p450_p2), %v2249_v8  ;;  %vm545_vm1 = vcmask (!%p450_p2), 1041408  }
   0x7   : > { %v2063_v5 = vpack.c.bf16 (!%p450_p2), %v532_v4, %v531_v2  ;;  %v535_v9 = vld [vmem:[%s2774_s2 + $0x30] sm:$0xff] (!%p450_p2)  ;;  %v536_v10 = vld [vmem:[%s2774_s2 + $0x38] sm:$0xff] (!%p450_p2)  ;;  %v2067_v11 = vpack.c.bf16 (!%p450_p2), %v534_v7, %v533_v6  ;;  %v537_v20 = vld [vmem:[%s2774_s2 + $0x40] sm:$0x3] (!%p450_p2)  ;;  %vm740_vm2 = vcmask (!%p450_p2), 1040384   ;;  %vm665_vm3 = vcmask (!%p450_p2), 1042432  }
   0x8   : > { %2060 = vmatprep.subr.bf16.mxu1 (!%p450_p2), %v2059_v3  ;;  %v2071_v18 = vpack.c.bf16 (!%p450_p2), %v536_v10, %v535_v9  ;;  %v2086_v22 = vld [vmem:[%s2775_s3] sm:$0xff] (!%p450_p2)   ;;  %v2087_v24 = vld [vmem:[%s2775_s3 + $0x8] sm:$0xff] (!%p450_p2)   ;;  %v2088_v25 = vld [vmem:[%s2775_s3 + $0x10] sm:$0xff] (!%p450_p2)   ;;  %vm2250_vm4 = vmmov (!%p450_p2), 0   ;;  %vm661_vm9 = vcmask (!%p450_p2), 179200   ;;  %v2251_v1 = vmov (!%p450_p2), 0  }
   0x9   : > { %2062 = vmatpush3.bf16.msra.mxu1 (!%p450_p2), %v2059_v3  ;;  %v2089_v26 = vld [vmem:[%s2775_s3 + $0x18] sm:$0xff] (!%p450_p2)   ;;  %v2090_v27 = vld [vmem:[%s2776_s4] sm:$0xff] (!%p450_p2)   ;;  %v2092_v30 = vld [vmem:[%s2776_s4 + $0x8] ss:$0 sps:$4 sm:$0x77] (!%p450_p2)   ;;  %2021 = vmatprep.mubr.msk.bf16.mxu0 (!%p450_p2), %vm2250_vm4, %v2249_v8 }
   0xa   : > { %2064 = vmatprep.subr.bf16.mxu1 (!%p450_p2), %v2063_v5  ;;  %v2091_v28 = vld [vmem:[%s2775_s3 + $0x20] ss:$0 sps:$4 sm:$0x11] (!%p450_p2)   ;;  %2018 = vmatpush3.bf16.msra.mxu0 (!%p450_p2), %v2090_v27  ;;  %v667_v31 = vsel (!%p450_p2), %vm665_vm3, %v2092_v30, 0  ;;  %v2095_v32 = vld [vmem:[%s2778_s6 + $0x4] ss:$8 sps:$4 sm:$0xff] (!%p450_p2)  }
   0xb   : > { %v742_v29 = vsel (!%p450_p2), %vm740_vm2, %v2091_v28, 0  ;;  %2019 = vmatprep.subr.bf16.mxu0 (!%p450_p2), %v2249_v8  ;;  %v2093_v45 = vld [vmem:[%s2778_s6] ss:$8 sps:$4 sm:$0xff] (!%p450_p2)   ;;  %v2098_v47 = vld [vmem:[%s2778_s6 + $0x14] ss:$8 sps:$4 sm:$0xff] (!%p450_p2)  }
   0xc   : > { %v2096_v48 = vld [vmem:[%s2778_s6 + $0x10] ss:$8 sps:$4 sm:$0xff] (!%p450_p2)   ;;  %v2101_v49 = vld [vmem:[%s2778_s6 + $0x24] ss:$8 sps:$4 sm:$0xff] (!%p450_p2)   ;;  %v2099_v50 = vld [vmem:[%s2778_s6 + $0x20] ss:$8 sps:$4 sm:$0xff] (!%p450_p2)  }
   0xd   : > { %s2789_s26 = smov (!%p503_p3, %s1819_s26), 3  ;;  %2066 = vmatpush3.bf16.msra.mxu1 %v2063_v5  ;;  %v2104_v51 = vld [vmem:[%s2778_s6 + $0x34] ss:$8 sps:$4 sm:$0xff]   ;;  %v2102_v52 = vld [vmem:[%s2778_s6 + $0x30] ss:$8 sps:$4 sm:$0xff]  }
   0xe   : > { %s2365_s23 = sshll.u32 %s2789_s26, 3  ;;  %2068 = vmatprep.subr.bf16.mxu1 %v2067_v11  ;;  %2020 = vmatpush3.bf16.msra.mxu0 %v667_v31  ;;  %v2107_v53 = vld [vmem:[%s2778_s6 + $0x44] ss:$8 sps:$4 sm:$0xff]   ;;  %v2105_v54 = vld [vmem:[%s2778_s6 + $0x40] ss:$8 sps:$4 sm:$0xff]  }
   0xf   : > { %s506_s27 = scalar_lea.vmem %s2772_s0, %s2365_s23  ;;  %s512_s30 = scalar_lea.vmem %s2773_s1, %s2365_s23  ;;  %905 = vmatprep.subr.bf16.mxu0 %v2095_v32  ;;  %v2110_v55 = vld [vmem:[%s2778_s6 + $0x54] ss:$8 sps:$4 sm:$0xff]   ;;  %v2108_v56 = vld [vmem:[%s2778_s6 + $0x50] ss:$8 sps:$4 sm:$0xff]   ;;  %v2113_v61 = vld [vmem:[%s2778_s6 + $0x64] ss:$8 sps:$4 sm:$0xff]  }
  0x10   : > { %v521_v12 = vld [vmem:[%s506_s27] sm:$0xff]  ;;  %v522_v13 = vld [vmem:[%s506_s27 + $0x8] sm:$0xff]  ;;  %v2116_v63 = vld [vmem:[%s2778_s6 + $0x74] ss:$8 sps:$4 sm:$0xff]   ;;  %s518_s17 = scalar_lea.vmem %s2787_s15, %s2365_s23 }
  0x11   : > { %v523_v14 = vld [vmem:[%s512_s30] sm:$0xff]  ;;  %v524_v15 = vld [vmem:[%s512_s30 + $0x8] sm:$0xff]  ;;  %v638_v17 = vpack.c.bf16 %v522_v13, %v521_v12  ;;  %2070 = vmatpush3.bf16.msra.mxu1 %v2067_v11  ;;  %v2114_v0 = vld [vmem:[%s2778_s6 + $0x70] ss:$8 sps:$4 sm:$0xff]  }
  0x12   : > { %v525_v16 = vsub.f32 %v521_v12, %v523_v14  ;;  %2072 = vmatprep.subr.bf16.mxu1 %v2071_v18  ;;  %v526_v21 = vsub.f32 %v522_v13, %v524_v15  ;;  %v2111_v62 = vld [vmem:[%s2778_s6 + $0x60] ss:$8 sps:$4 sm:$0xff]   ;;  %v2119_v3 = vld [vmem:[%s2780_s8 + $0x4] ss:$8 sps:$4 sm:$0xff]   ;;  %v2122_v4 = vld [vmem:[%s2780_s8 + $0x14] ss:$8 sps:$4 sm:$0xff]  }
  0x13   : > { %v2117_v2 = vld [vmem:[%s2780_s8] ss:$8 sps:$4 sm:$0xff]   ;;  %v2120_v5 = vld [vmem:[%s2780_s8 + $0x10] ss:$8 sps:$4 sm:$0xff]   ;;  %v2125_v6 = vld [vmem:[%s2780_s8 + $0x24] ss:$8 sps:$4 sm:$0xff]  }
  0x14   : > { %v527_v19 = vmul.f32 %v525_v16, %v525_v16  ;;  %v528_v23 = vmul.f32 %v526_v21, %v526_v21  ;;  %v2123_v7 = vld [vmem:[%s2780_s8 + $0x20] ss:$8 sps:$4 sm:$0xff]   ;;  %v2128_v9 = vld [vmem:[%s2780_s8 + $0x34] ss:$8 sps:$4 sm:$0xff]   ;;  %v2126_v10 = vld [vmem:[%s2780_s8 + $0x30] ss:$8 sps:$4 sm:$0xff]  }
  0x15   : > { %2074 = vmatpush3.bf16.msra.mxu1 %v2071_v18  ;;  %v2131_v11 = vld [vmem:[%s2780_s8 + $0x44] ss:$8 sps:$4 sm:$0xff]   ;;  %v2129_v12 = vld [vmem:[%s2780_s8 + $0x40] ss:$8 sps:$4 sm:$0xff]   ;;  %v2134_v13 = vld [vmem:[%s2780_s8 + $0x54] ss:$8 sps:$4 sm:$0xff]  }
  0x16   : > { %2014 = vmatprep.mubr.msk.f32.mxu1 %vm538_vm0, %v527_v19  ;;  %2012 = vmatprep.subr.msk.mxu1 %vm545_vm1, %v537_v20  ;;  %v2132_v14 = vld [vmem:[%s2780_s8 + $0x50] ss:$8 sps:$4 sm:$0xff]   ;;  %v2137_v15 = vld [vmem:[%s2780_s8 + $0x64] ss:$8 sps:$4 sm:$0xff]   ;;  %v2135_v16 = vld [vmem:[%s2780_s8 + $0x60] ss:$8 sps:$4 sm:$0xff]  }
  0x17   : > { %v2138_v18 = vld [vmem:[%s2780_s8 + $0x70] ss:$8 sps:$4 sm:$0xff]   ;;  %v2143_v19 = vld [vmem:[%s2780_s8 + $0x84] ss:$8 sps:$4 sm:$0xff]   ;;  %v2146_v21 = vld [vmem:[%s2780_s8 + $0x94] ss:$8 sps:$4 sm:$0xff]  }
  0x18   : > { %v2155_v27 = vld [vmem:[%s2780_s8 + $0xc4] ss:$8 sps:$4 sm:$0xff]   ;;  %v2153_v28 = vld [vmem:[%s2780_s8 + $0xc0] ss:$8 sps:$4 sm:$0xff]   ;;  %v2156_v30 = vld [vmem:[%s2780_s8 + $0xd0] ss:$8 sps:$4 sm:$0xff]  }
  0x19   : > { %2013 = vmatpush3.msk.msra.mxu1 %vm545_vm1, %v537_v20  ;;  %v2141_v20 = vld [vmem:[%s2780_s8 + $0x80] ss:$8 sps:$4 sm:$0xff]  }
  0x1a   : > { %2015 = vmatmul.mubr.msk.f32.vlgmr.msra.gmra.mrb[0].mxu1 %vm538_vm0, %v528_v23  ;;  %2025 = vmatprep.subr.bf16.mxu1 %v2249_v8  ;;  %v2149_v23 = vld [vmem:[%s2780_s8 + $0xa4] ss:$8 sps:$4 sm:$0xff]   ;;  %v1837_v32 = vld [vmem:[%s2777_s5] ss:$0 sm:$0xff] }
  0x1b   : > { %2026 = vmatpush3.bf16.msra.mxu1 %v2086_v22  ;;  %2035 = vmatprep.mubr.msk.bf16.mxu1 %vm2250_vm4, %v2249_v8  ;;  %v2144_v22 = vld [vmem:[%s2780_s8 + $0x90] ss:$8 sps:$4 sm:$0xff]  }
  0x1c   : > { %2027 = vmatprep.subr.bf16.mxu1 %v2249_v8 }
  0x1f   : > { %2028 = vmatpush3.bf16.msra.mxu1 %v2087_v24  ;;  %v2147_v24 = vld [vmem:[%s2780_s8 + $0xa0] ss:$8 sps:$4 sm:$0xff]  }
  0x20   : > { %2029 = vmatprep.subr.bf16.mxu1 %v2249_v8 }
  0x23   : > { %2030 = vmatpush3.bf16.msra.mxu1 %v2088_v25  ;;  %v2152_v25 = vld [vmem:[%s2780_s8 + $0xb4] ss:$8 sps:$4 sm:$0xff]  }
  0x24   : > { %2031 = vmatprep.subr.bf16.mxu1 %v2249_v8 }
  0x27   : > { %2032 = vmatpush3.bf16.msra.mxu1 %v2089_v26  ;;  %v2150_v26 = vld [vmem:[%s2780_s8 + $0xb0] ss:$8 sps:$4 sm:$0xff]  }
  0x28   : > { %2033 = vmatprep.subr.bf16.mxu1 %v2249_v8 }
  0x2b   : > { %2034 = vmatpush3.bf16.msra.mxu1 %v742_v29  ;;  %v2158_v29 = vld [vmem:[%s2780_s8 + $0xd4] ss:$8 sps:$4 sm:$0xff]  }
  0x2c   : > { %1158 = vmatprep.subr.bf16.mxu1 %v2119_v3  ;;  %v2197_v3 = vld [vmem:[%s2782_s10 + $0xa4] ss:$8 sps:$4 sm:$0xff]  }
  0x2e   : > { %2036 = vmatmul.mubr.msk.bf16.vlgmr.msra.gmra.mrb[4].mxu1 %vm538_vm0, %v638_v17  ;;  %v2140_v17 = vld [vmem:[%s2780_s8 + $0x74] ss:$8 sps:$4 sm:$0xff]  }
  0x2f   : > { %1159 = vmatpush1.bf16.msra.mxu1 %v2117_v2  ;;  %v2192_v2 = vld [vmem:[%s2782_s10 + $0x90] ss:$8 sps:$4 sm:$0xff]  }
  0x30   : > { %1160 = vmatprep.subr.bf16.mxu1 %v2122_v4  ;;  %v2195_v4 = vld [vmem:[%s2782_s10 + $0xa0] ss:$8 sps:$4 sm:$0xff]  }
  0x33   : > { %1161 = vmatpush1.bf16.msra.mxu1 %v2120_v5  ;;  %v2200_v5 = vld [vmem:[%s2782_s10 + $0xb4] ss:$8 sps:$4 sm:$0xff]  }
  0x34   : > { %1162 = vmatprep.subr.bf16.mxu1 %v2125_v6  ;;  %v2198_v6 = vld [vmem:[%s2782_s10 + $0xb0] ss:$8 sps:$4 sm:$0xff]  }
  0x37   : > { %1163 = vmatpush1.bf16.msra.mxu1 %v2123_v7  ;;  %v2203_v7 = vld [vmem:[%s2782_s10 + $0xc4] ss:$8 sps:$4 sm:$0xff]  }
  0x38   : > { %1164 = vmatprep.subr.bf16.mxu1 %v2128_v9  ;;  %v2201_v9 = vld [vmem:[%s2782_s10 + $0xc0] ss:$8 sps:$4 sm:$0xff]  }
  0x3b   : > { %1165 = vmatpush1.bf16.msra.mxu1 %v2126_v10  ;;  %v2206_v10 = vld [vmem:[%s2782_s10 + $0xd4] ss:$8 sps:$4 sm:$0xff]  }
  0x3c   : > { %1166 = vmatprep.subr.bf16.mxu1 %v2131_v11  ;;  %v2204_v11 = vld [vmem:[%s2782_s10 + $0xd0] ss:$8 sps:$4 sm:$0xff]  }
  0x3f   : > { %1167 = vmatpush1.bf16.msra.mxu1 %v2129_v12  ;;  %v815_v12 = vlaneseq }
  0x40   : > { %1168 = vmatprep.subr.bf16.mxu1 %v2134_v13 }
  0x41   : > { %v816_v13 = vshrl.u32 %v815_v12, 7  ;;  %v1239_v12 = vld [vmem:[%s2783_s11] sm:$0x3] }
  0x43   : > { %1169 = vmatpush1.bf16.msra.mxu1 %v2132_v14  ;;  %v2649_v14 = vsub.s32 0, %v816_v13 }
  0x44   : > { %1170 = vmatprep.subr.bf16.mxu1 %v2137_v15  ;;  %v813_v15 = vld [vmem:[%s2779_s7] sm:$0x3] }
  0x47   : > { %1171 = vmatpush1.bf16.msra.mxu1 %v2135_v16  ;;  %v2654_v16 = vsub.s32 1, %v816_v13  ;;  %v1244_v13 = vrot.slane %v1239_v12, %v2649_v14 }
  0x48   : > { %1172 = vmatprep.subr.bf16.mxu1 %v2140_v17  ;;  %v818_v17 = vrot.slane %v813_v15, %v2649_v14 }
  0x4b   : > { %1173 = vmatpush1.bf16.msra.mxu1 %v2138_v18  ;;  %v822_v18 = vrot.slane %v813_v15, %v2654_v16  ;;  %v1248_v15 = vrot.slane %v1239_v12, %v2654_v16 }
  0x4c   : > { %1174 = vmatprep.subr.bf16.mxu1 %v2143_v19 }
  0x4f   : > { %1175 = vmatpush1.bf16.msra.mxu1 %v2141_v20 }
  0x50   : > { %1176 = vmatprep.subr.bf16.mxu1 %v2146_v21 }
  0x53   : > { %1177 = vmatpush1.bf16.msra.mxu1 %v2144_v22 }
  0x54   : > { %1178 = vmatprep.subr.bf16.mxu1 %v2149_v23 }
  0x57   : > { %1179 = vmatpush1.bf16.msra.mxu1 %v2147_v24 }
  0x58   : > { %1180 = vmatprep.subr.bf16.mxu1 %v2152_v25 }
  0x5b   : > { %1181 = vmatpush1.bf16.msra.mxu1 %v2150_v26 }
  0x5c   : > { %1182 = vmatprep.subr.bf16.mxu1 %v2155_v27 }
  0x5f   : > { %1183 = vmatpush1.bf16.msra.mxu1 %v2153_v28 }
  0x60   : > { %1184 = vmatprep.subr.bf16.mxu1 %v2158_v29 }
  0x63   : > { %1185 = vmatpush1.bf16.msra.mxu1 %v2156_v30 }
  0xed   : > { %v2016_v33 = vpop.f32.mrb[0].mxu1 }
  0xee   : > { %2237 = vrsqrt.f32 %v2016_v33  ;;  %v615_v34 = vpop.f32.mrb[1].mxu1  ;;  %vm633_vm5 = vcmp.eq.f32.partialorder %v2016_v33, inf  ;;  %v636_v38 = vand.u32 2147483648, %v2016_v33  ;;  %vm635_vm7 = vcmp.eq.f32.partialorder %v2016_v33, 0.0 }
  0xef   : > { %2239 = vrsqrt.f32 %v615_v34  ;;  %vm626_vm6 = vcmp.eq.f32.partialorder %v615_v34, inf  ;;  %v629_v40 = vand.u32 2147483648, %v615_v34  ;;  %vm628_vm8 = vcmp.eq.f32.partialorder %v615_v34, 0.0 }
  0xf8   : > { %v2238_v35 = vpop.eup %2237 }
  0xf9   : > { %v2240_v36 = vpop.eup %2239  ;;  %v632_v37 = vmul.f32 %v2238_v35, %v2016_v33 }
  0xfa   : > { %v625_v39 = vmul.f32 %v2240_v36, %v615_v34 }
  0xfb   : > { %v634_v41 = vsel %vm633_vm5, %v2016_v33, %v632_v37 }
  0xfc   : > { %v627_v42 = vsel %vm626_vm6, %v615_v34, %v625_v39  ;;  %v637_v43 = vsel %vm635_vm7, %v636_v38, %v634_v41 }
  0xfd   : > { %v630_v44 = vsel %vm628_vm8, %v629_v40, %v627_v42 }
  0xfe   : > { %v648_v46 = vpack.c.bf16 %v637_v43, %v630_v44  ;;  %v2161_v43 = vld [vmem:[%s2780_s8 + $0xe4] ss:$8 sps:$4 sm:$0xff]   ;;  %v2159_v44 = vld [vmem:[%s2780_s8 + $0xe0] ss:$8 sps:$4 sm:$0xff]  }
  0xff   : > { %1186 = vmatprep.subr.bf16.mxu1 %v2161_v43  ;;  %v2219_v43 = vld [vmem:[%s2784_s12 + $0x58] sm:$0xff]  }
 0x100   : > { %2022 = vmatmul.mubr.msk.bf16.vlgmr.msra.gmra.mrb[0].mxu0 %vm661_vm9, %v648_v46  ;;  %1187 = vmatpush1.bf16.msra.mxu1 %v2159_v44  ;;  %v2162_v46 = vld [vmem:[%s2780_s8 + $0xf0] ss:$8 sps:$4 sm:$0xff]  }
 0x101   : > { %906 = vmatpush1.bf16.msra.mxu0 %v2093_v45  ;;  %v2448_v57 = vpop.f32.mrb[4].mxu1  ;;  %937 = vmatprep.mubr.bf16.mxu0 %v2251_v1  ;;  %v2164_v45 = vld [vmem:[%s2780_s8 + $0xf4] ss:$8 sps:$4 sm:$0xff]  }
 0x102   : > { %907 = vmatprep.subr.bf16.mxu0 %v2098_v47  ;;  %v2037_v58 = vpop.f32.mrb[5].mxu1  ;;  %1188 = vmatprep.subr.bf16.mxu1 %v2164_v45  ;;  %v2165_v47 = vld [vmem:[%s2782_s10] ss:$8 sps:$4 sm:$0xff]   ;;  %v2194_v1 = vld [vmem:[%s2782_s10 + $0x94] ss:$8 sps:$4 sm:$0xff]  }
 0x103   : > { %v2450_v59 = vpop.f32.mrb[6].mxu1  ;;  %v2180_v58 = vld [vmem:[%s2782_s10 + $0x50] ss:$8 sps:$4 sm:$0xff]   ;;  %v2221_v45 = vld [vmem:[%s2784_s12 + $0x60] sm:$0xff]  }
 0x104   : > { %v2038_v60 = vpop.f32.mrb[7].mxu1  ;;  %1189 = vmatpush1.bf16.msra.mxu1 %v2162_v46  ;;  %v2220_v44 = vld [vmem:[%s2784_s12 + $0x18] sm:$0xff]   ;;  %v2222_v46 = vld [vmem:[%s2784_s12 + $0x20] sm:$0xff]  }
 0x105   : > { %908 = vmatpush1.bf16.msra.mxu0 %v2096_v48  ;;  %v2167_v48 = vld [vmem:[%s2782_s10 + $0x4] ss:$8 sps:$4 sm:$0xff]   ;;  %v2183_v60 = vld [vmem:[%s2782_s10 + $0x60] ss:$8 sps:$4 sm:$0xff]  }
 0x106   : > { %909 = vmatprep.subr.bf16.mxu0 %v2101_v49  ;;  %v2170_v49 = vld [vmem:[%s2782_s10 + $0x14] ss:$8 sps:$4 sm:$0xff]  }
 0x109   : > { %910 = vmatpush1.bf16.msra.mxu0 %v2099_v50  ;;  %v2168_v50 = vld [vmem:[%s2782_s10 + $0x10] ss:$8 sps:$4 sm:$0xff]  }
 0x10a   : > { %911 = vmatprep.subr.bf16.mxu0 %v2104_v51  ;;  %v2173_v51 = vld [vmem:[%s2782_s10 + $0x24] ss:$8 sps:$4 sm:$0xff]  }
 0x10d   : > { %912 = vmatpush1.bf16.msra.mxu0 %v2102_v52  ;;  %v2171_v52 = vld [vmem:[%s2782_s10 + $0x20] ss:$8 sps:$4 sm:$0xff]  }
 0x10e   : > { %913 = vmatprep.subr.bf16.mxu0 %v2107_v53  ;;  %v2176_v53 = vld [vmem:[%s2782_s10 + $0x34] ss:$8 sps:$4 sm:$0xff]  }
 0x111   : > { %914 = vmatpush1.bf16.msra.mxu0 %v2105_v54  ;;  %v2174_v54 = vld [vmem:[%s2782_s10 + $0x30] ss:$8 sps:$4 sm:$0xff]  }
 0x112   : > { %915 = vmatprep.subr.bf16.mxu0 %v2110_v55  ;;  %v2179_v55 = vld [vmem:[%s2782_s10 + $0x44] ss:$8 sps:$4 sm:$0xff]  }
 0x115   : > { %916 = vmatpush1.bf16.msra.mxu0 %v2108_v56  ;;  %v2177_v56 = vld [vmem:[%s2782_s10 + $0x40] ss:$8 sps:$4 sm:$0xff]  }
 0x116   : > { %917 = vmatprep.subr.bf16.mxu0 %v2113_v61  ;;  %v2188_v61 = vld [vmem:[%s2782_s10 + $0x74] ss:$8 sps:$4 sm:$0xff]  }
 0x119   : > { %918 = vmatpush1.bf16.msra.mxu0 %v2111_v62  ;;  %v2186_v62 = vld [vmem:[%s2782_s10 + $0x70] ss:$8 sps:$4 sm:$0xff]  }
 0x11a   : > { %919 = vmatprep.subr.bf16.mxu0 %v2116_v63  ;;  %v2191_v63 = vld [vmem:[%s2782_s10 + $0x84] ss:$8 sps:$4 sm:$0xff]  }
 0x11d   : > { %920 = vmatpush1.bf16.msra.mxu0 %v2114_v0  ;;  %v2189_v0 = vld [vmem:[%s2782_s10 + $0x80] ss:$8 sps:$4 sm:$0xff]  }
 0x11e   : > { %1411 = vmatprep.subr.bf16.mxu0 %v2167_v48  ;;  %v986_v48 = vld [vmem:[%s2781_s9] sm:$0x3] }
 0x1d3   : > { %v703_v31 = vpop.f32.mrb[0].mxu0 }
 0x1d4   : > { %v779_v33 = vadd.f32 %v2448_v57, %v703_v31  ;;  %v2023_v34 = vpop.f32.mrb[1].mxu0  ;;  %v2182_v57 = vld [vmem:[%s2782_s10 + $0x54] ss:$8 sps:$4 sm:$0xff]  }
 0x1d5   : > { %v706_v35 = vpop.f32.mrb[2].mxu0  ;;  %v2207_v34 = vld [vmem:[%s2782_s10 + $0xe0] ss:$8 sps:$4 sm:$0xff]  }
 0x1d6   : > { %v792_v36 = vadd.f32 %v1837_v32, %v779_v33  ;;  %v782_v37 = vadd.f32 %v2450_v59, %v706_v35  ;;  %v2024_v38 = vpop.f32.mrb[3].mxu0  ;;  %v2185_v59 = vld [vmem:[%s2782_s10 + $0x64] ss:$8 sps:$4 sm:$0xff]   ;;  %v2212_v35 = vld [vmem:[%s2782_s10 + $0xf4] ss:$8 sps:$4 sm:$0xff]  }
 0x1d7   : > { %v2209_v33 = vld [vmem:[%s2782_s10 + $0xe4] ss:$8 sps:$4 sm:$0xff]  }
 0x1d8   : > { %v793_v39 = vadd.f32 %v1837_v32, %v782_v37  ;;  %v794_v40 = vmax.f32 %v792_v36, 0.0  ;;  %v2210_v36 = vld [vmem:[%s2782_s10 + $0xf0] ss:$8 sps:$4 sm:$0xff]   ;;  %v2213_v37 = vld [vmem:[%s2784_s12 + $0x40] sm:$0xff]  }
 0x1d9   : > { %v2214_v38 = vld [vmem:[%s2784_s12] sm:$0xff]   ;;  %1965 = vmatprep.subr.bf16.mxu1 %v2213_v37 }
 0x1da   : > { %v795_v41 = vmax.f32 %v793_v39, 0.0  ;;  %v2215_v39 = vld [vmem:[%s2784_s12 + $0x48] sm:$0xff]  }
 0x1dc   : > { %v796_v42 = vpack.c.bf16 %v795_v41, %v794_v40  ;;  %v2216_v40 = vld [vmem:[%s2784_s12 + $0x8] sm:$0xff]   ;;  %v2217_v41 = vld [vmem:[%s2784_s12 + $0x50] sm:$0xff]  }
 0x1de   : > { %938 = vmatmul.mubr.bf16.vlgmr.msra.gmra.mrb[4].mxu0 %v796_v42  ;;  %v2218_v42 = vld [vmem:[%s2784_s12 + $0x10] sm:$0xff]  }
 0x1df   : > { %1412 = vmatpush1.bf16.msra.mxu0 %v2165_v47  ;;  %v2223_v47 = vld [vmem:[%s2784_s12 + $0x68] sm:$0xff]  }
 0x1e0   : > { %1413 = vmatprep.subr.bf16.mxu0 %v2170_v49  ;;  %v991_v49 = vrot.slane %v986_v48, %v2649_v14  ;;  %v2234_v14 = vld [vmem:[%s2786_s14 + $0x28] sm:$0xff]  }
 0x1e3   : > { %1414 = vmatpush1.bf16.msra.mxu0 %v2168_v50  ;;  %v995_v50 = vrot.slane %v986_v48, %v2654_v16  ;;  %v2235_v16 = vld [vmem:[%s2786_s14 + $0x30] sm:$0xff]  }
 0x1e4   : > { %1415 = vmatprep.subr.bf16.mxu0 %v2173_v51 }
 0x1e7   : > { %1416 = vmatpush1.bf16.msra.mxu0 %v2171_v52 }
 0x1e8   : > { %1417 = vmatprep.subr.bf16.mxu0 %v2176_v53 }
 0x1eb   : > { %1418 = vmatpush1.bf16.msra.mxu0 %v2174_v54 }
 0x1ec   : > { %1419 = vmatprep.subr.bf16.mxu0 %v2179_v55 }
 0x1ef   : > { %1420 = vmatpush1.bf16.msra.mxu0 %v2177_v56 }
 0x1f0   : > { %1421 = vmatprep.subr.bf16.mxu0 %v2182_v57 }
 0x1f3   : > { %1422 = vmatpush1.bf16.msra.mxu0 %v2180_v58 }
 0x1f4   : > { %1423 = vmatprep.subr.bf16.mxu0 %v2185_v59 }
 0x1f7   : > { %1424 = vmatpush1.bf16.msra.mxu0 %v2183_v60 }
 0x1f8   : > { %1425 = vmatprep.subr.bf16.mxu0 %v2188_v61 }
 0x1fb   : > { %1426 = vmatpush1.bf16.msra.mxu0 %v2186_v62 }
 0x1fc   : > { %1427 = vmatprep.subr.bf16.mxu0 %v2191_v63 }
 0x1ff   : > { %1428 = vmatpush1.bf16.msra.mxu0 %v2189_v0 }
 0x200   : > { %1429 = vmatprep.subr.bf16.mxu0 %v2194_v1  ;;  %v2224_v1 = vld [vmem:[%s2784_s12 + $0x28] sm:$0xff]  }
 0x203   : > { %1430 = vmatpush1.bf16.msra.mxu0 %v2192_v2  ;;  %v2225_v2 = vld [vmem:[%s2784_s12 + $0x70] sm:$0xff]  }
 0x204   : > { %1431 = vmatprep.subr.bf16.mxu0 %v2197_v3  ;;  %v2226_v3 = vld [vmem:[%s2784_s12 + $0x30] sm:$0xff]  }
 0x207   : > { %1432 = vmatpush1.bf16.msra.mxu0 %v2195_v4  ;;  %v2227_v4 = vld [vmem:[%s2784_s12 + $0x78] sm:$0xff]  }
 0x208   : > { %1433 = vmatprep.subr.bf16.mxu0 %v2200_v5  ;;  %v2228_v5 = vld [vmem:[%s2784_s12 + $0x38] sm:$0xff]  }
 0x20b   : > { %1434 = vmatpush1.bf16.msra.mxu0 %v2198_v6  ;;  %v2229_v6 = vld [vmem:[%s2786_s14] sm:$0xff]  }
 0x20c   : > { %1435 = vmatprep.subr.bf16.mxu0 %v2203_v7  ;;  %v2230_v7 = vld [vmem:[%s2786_s14 + $0x8] sm:$0xff]  }
 0x20f   : > { %1436 = vmatpush1.bf16.msra.mxu0 %v2201_v9  ;;  %v2231_v9 = vld [vmem:[%s2786_s14 + $0x10] sm:$0xff]  }
 0x210   : > { %1437 = vmatprep.subr.bf16.mxu0 %v2206_v10  ;;  %v2232_v10 = vld [vmem:[%s2786_s14 + $0x18] sm:$0xff]  }
 0x213   : > { %1438 = vmatpush1.bf16.msra.mxu0 %v2204_v11  ;;  %v2233_v11 = vld [vmem:[%s2786_s14 + $0x20] sm:$0xff]  }
 0x214   : > { %1439 = vmatprep.subr.bf16.mxu0 %v2209_v33  ;;  %v1918_v33 = vld [vmem:[%s2785_s13] ss:$0 sm:$0xff] }
 0x217   : > { %1440 = vmatpush1.bf16.msra.mxu0 %v2207_v34 }
 0x218   : > { %1441 = vmatprep.subr.bf16.mxu0 %v2212_v35 }
 0x21b   : > { %1442 = vmatpush1.bf16.msra.mxu0 %v2210_v36 }
 0x21c   : > { %2039 = vmatprep.subr.bf16.mxu0 %v2249_v8 }
 0x2b1   : > { %v939_v19 = vpop.f32.mrb[4].mxu0 }
 0x2b2   : > { %v940_v20 = vadd.f32 %v939_v19, %v818_v17  ;;  %v941_v21 = vpop.f32.mrb[5].mxu0 }
 0x2b3   : > { %v942_v22 = vadd.f32 %v941_v21, %v822_v18  ;;  %v943_v23 = vpop.f32.mrb[6].mxu0 }
 0x2b4   : > { %v944_v24 = vadd.f32 %v943_v23, %v818_v17  ;;  %v945_v25 = vpop.f32.mrb[7].mxu0  ;;  %v948_v27 = vmax.f32 %v940_v20, 0.0 }
 0x2b5   : > { %v946_v26 = vadd.f32 %v945_v25, %v822_v18  ;;  %v949_v29 = vmax.f32 %v942_v22, 0.0 }
 0x2b6   : > { %v950_v28 = vmax.f32 %v944_v24, 0.0 }
 0x2b7   : > { %v951_v30 = vmax.f32 %v946_v26, 0.0 }
 0x2b8   : > { %v952_v31 = vpack.c.bf16 %v950_v28, %v948_v27 }
 0x2b9   : > { %v953_v32 = vpack.c.bf16 %v951_v30, %v949_v29 }
 0x2bb   : > { %1190 = vmatprep.mubr.bf16.mxu1 %v953_v32 }
 0x2bc   : > { %1191 = vmatmul.mubr.bf16.vlgmr.msra.gmra.mrb[8].mxu1 %v952_v31  ;;  %v2236_v31 = vld [vmem:[%s2786_s14 + $0x38] sm:$0xff]  }
 0x2bd   : > { %1966 = vmatpush3.bf16.msra.mxu1 %v2214_v38 }
 0x2be   : > { %1967 = vmatprep.subr.bf16.mxu1 %v2215_v39 }
 0x2c1   : > { %1968 = vmatpush3.bf16.msra.mxu1 %v2216_v40 }
 0x2c2   : > { %1969 = vmatprep.subr.bf16.mxu1 %v2217_v41 }
 0x2c5   : > { %1970 = vmatpush3.bf16.msra.mxu1 %v2218_v42 }
 0x2c6   : > { %1971 = vmatprep.subr.bf16.mxu1 %v2219_v43 }
 0x2c9   : > { %1972 = vmatpush3.bf16.msra.mxu1 %v2220_v44 }
 0x2ca   : > { %1973 = vmatprep.subr.bf16.mxu1 %v2221_v45 }
 0x2cd   : > { %1974 = vmatpush3.bf16.msra.mxu1 %v2222_v46 }
 0x2ce   : > { %1975 = vmatprep.subr.bf16.mxu1 %v2223_v47 }
 0x2d1   : > { %1976 = vmatpush3.bf16.msra.mxu1 %v2224_v1 }
 0x2d2   : > { %1977 = vmatprep.subr.bf16.mxu1 %v2225_v2 }
 0x2d5   : > { %1978 = vmatpush3.bf16.msra.mxu1 %v2226_v3 }
 0x2d6   : > { %1979 = vmatprep.subr.bf16.mxu1 %v2227_v4 }
 0x2d9   : > { %1980 = vmatpush3.bf16.msra.mxu1 %v2228_v5 }
 0x38f   : > { %v1192_v51 = vpop.f32.mrb[8].mxu1 }
 0x390   : > { %v1193_v52 = vadd.f32 %v1192_v51, %v991_v49  ;;  %v1194_v53 = vpop.f32.mrb[9].mxu1 }
 0x391   : > { %v1195_v54 = vadd.f32 %v1194_v53, %v995_v50  ;;  %v1196_v55 = vpop.f32.mrb[10].mxu1 }
 0x392   : > { %v1197_v56 = vadd.f32 %v1196_v55, %v991_v49  ;;  %v1198_v57 = vpop.f32.mrb[11].mxu1  ;;  %v1201_v59 = vmax.f32 %v1193_v52, 0.0 }
 0x393   : > { %v1199_v58 = vadd.f32 %v1198_v57, %v995_v50  ;;  %v1202_v61 = vmax.f32 %v1195_v54, 0.0 }
 0x394   : > { %v1203_v60 = vmax.f32 %v1197_v56, 0.0 }
 0x395   : > { %v1204_v62 = vmax.f32 %v1199_v58, 0.0 }
 0x396   : > { %v1205_v63 = vpack.c.bf16 %v1203_v60, %v1201_v59 }
 0x397   : > { %v1206_v0 = vpack.c.bf16 %v1204_v62, %v1202_v61 }
 0x399   : > { %1443 = vmatprep.mubr.bf16.mxu0 %v1206_v0 }
 0x39a   : > { %1444 = vmatmul.mubr.bf16.vlgmr.msra.gmra.mrb[8].mxu0 %v1205_v63 }
 0x39b   : > { %2055 = vmatprep.mubr.msk.bf16.mxu0 %vm2250_vm4, %v2249_v8  ;;  %2040 = vmatpush3.bf16.msra.mxu0 %v2229_v6 }
 0x39c   : > { %2041 = vmatprep.subr.bf16.mxu0 %v2249_v8 }
 0x39f   : > { %2042 = vmatpush3.bf16.msra.mxu0 %v2230_v7 }
 0x3a0   : > { %2043 = vmatprep.subr.bf16.mxu0 %v2249_v8 }
 0x3a3   : > { %2044 = vmatpush3.bf16.msra.mxu0 %v2231_v9 }
 0x3a4   : > { %2045 = vmatprep.subr.bf16.mxu0 %v2249_v8 }
 0x3a7   : > { %2046 = vmatpush3.bf16.msra.mxu0 %v2232_v10 }
 0x3a8   : > { %2047 = vmatprep.subr.bf16.mxu0 %v2249_v8 }
 0x3ab   : > { %2048 = vmatpush3.bf16.msra.mxu0 %v2233_v11 }
 0x3ac   : > { %2049 = vmatprep.subr.bf16.mxu0 %v2249_v8 }
 0x3af   : > { %2050 = vmatpush3.bf16.msra.mxu0 %v2234_v14 }
 0x3b0   : > { %2051 = vmatprep.subr.bf16.mxu0 %v2249_v8 }
 0x3b3   : > { %2052 = vmatpush3.bf16.msra.mxu0 %v2235_v16 }
 0x3b4   : > { %2053 = vmatprep.subr.bf16.mxu0 %v2249_v8 }
 0x3b7   : > { %2054 = vmatpush3.bf16.msra.mxu0 %v2236_v31 }
 0x46d   : > { %v1445_v17 = vpop.f32.mrb[8].mxu0 }
 0x46e   : > { %v1446_v18 = vadd.f32 %v1445_v17, %v1244_v13  ;;  %v1447_v19 = vpop.f32.mrb[9].mxu0 }
 0x46f   : > { %v1448_v20 = vadd.f32 %v1447_v19, %v1248_v15  ;;  %v1449_v21 = vpop.f32.mrb[10].mxu0 }
 0x470   : > { %v1450_v22 = vadd.f32 %v1449_v21, %v1244_v13  ;;  %v1451_v23 = vpop.f32.mrb[11].mxu0  ;;  %v1454_v25 = vmax.f32 %v1446_v18, 0.0 }
 0x471   : > { %v1452_v24 = vadd.f32 %v1451_v23, %v1248_v15  ;;  %v1455_v27 = vmax.f32 %v1448_v20, 0.0 }
 0x472   : > { %v1456_v26 = vmax.f32 %v1450_v22, 0.0 }
 0x473   : > { %v1457_v28 = vmax.f32 %v1452_v24, 0.0 }
 0x474   : > { %v1458_v29 = vpack.c.bf16 %v1456_v26, %v1454_v25 }
 0x475   : > { %v1459_v30 = vpack.c.bf16 %v1457_v28, %v1455_v27 }
 0x477   : > { %1627 = vmatprep.mubr.bf16.mxu1 %v1459_v30 }
 0x478   : > { %1628 = vmatmul.mubr.bf16.vlgmr.msra.gmra.mrb[12].mxu1 %v1458_v29 }
 0x54b   : > { %v1981_v32 = vpop.f32.mrb[12].mxu1 }
 0x54c   : > { %v1982_v34 = vpop.f32.mrb[13].mxu1 }
 0x54d   : > { %v1983_v35 = vadd.f32 %v1982_v34, %v1981_v32  ;;  %v1984_v36 = vpop.f32.mrb[14].mxu1 }
 0x54e   : > { %v1985_v37 = vpop.f32.mrb[15].mxu1 }
 0x54f   : > { %v1630_v38 = vadd.f32 %v1983_v35, %v1918_v33  ;;  %v1986_v39 = vadd.f32 %v1985_v37, %v1984_v36 }
 0x551   : > { %v1633_v40 = vadd.f32 %v1986_v39, %v1918_v33  ;;  %v1636_v41 = vmax.f32 %v1630_v38, 0.0 }
 0x553   : > { %v1637_v8 = vmax.f32 %v1633_v40, 0.0 }
 0x555   : > { %v1638_v42 = vpack.c.bf16 %v1637_v8, %v1636_v41 }
 0x557   : > { %2056 = vmatmul.mubr.bf16.vlgmr.msra.gmra.mrb[12].mxu0 %v1638_v42 }
 0x62a   : > { %v1737_v43 = vpop.f32.mrb[12].mxu0 }
 0x62b   : > { %1744 = vst [vmem:[%s518_s17] sm:$0xff] %v1737_v43  ;;  %v2057_v44 = vpop.f32.mrb[13].mxu0 }
 0x62c   : > { %v1740_v45 = vpop.f32.mrb[14].mxu0 }
 0x62d   : > { %1745 = vst [vmem:[%s518_s17 + $0x8] sm:$0xff] %v1740_v45  ;;  %v2058_v46 = vpop.f32.mrb[15].mxu0 }
 0x62e PF: > { %s25_s18 = sadd.s32 1, %s2247_s18  }
 0x62f   : > { %p22_p4 = scmp.ge.s32.totalorder %s25_s18, 4  }
 0x631   :  { %24 = sbr.rel (!%p22_p4) target bundleno = 1 (0x1), region = 113 }

</bundles_post_ra>
